<compile_context>
chip_gen: v6e
topology: v6e:2x2x1
jax: 0.10.0
libtpu: 0.0.40
codegen_flags: <defaults>
</compile_context>

<pallas_src>
import functools

import jax
import jax.numpy as jnp
from jax.experimental import pallas as pl
from jax.experimental.pallas import tpu as pltpu

IGNORE_LABEL = -1
_LANES = 128
_SCORE_BLOCK_BUDGET = 8 << 20   # per-buffer score-block target (~8 MiB, roofline plateau)


def _ce_kernel(score_ref, target_ref, loss_ref, cnt_ref, *,
               num_classes, tile_s, s_total):
    # score_ref : (1, C, tile_s, 128)     target_ref: (1, tile_s, 128) int32
    # loss_ref / cnt_ref : (1, 1, 1, 128) float32 lane partials for this block
    j = pl.program_id(1)

    t = target_ref[0]                                   # (tile_s, 128)
    valid = t != IGNORE_LABEL
    if s_total % tile_s != 0:
        # last pixel block overhangs the array -> mask the garbage rows
        row = jax.lax.broadcasted_iota(jnp.int32, (tile_s, _LANES), 0)
        valid = jnp.logical_and(valid, (j * tile_s + row) < s_total)

    # pass 1: running max over classes in the native dtype (max is exact in bf16)
    m = score_ref[0, 0]
    for c in range(1, num_classes):
        m = jnp.maximum(m, score_ref[0, c])
    m32 = m.astype(jnp.float32)                          # (tile_s, 128)

    # pass 2: fused sum-exp + target gather while each class row is in vregs
    sum_p = jnp.zeros((tile_s, _LANES), jnp.float32)
    tgt = jnp.zeros((tile_s, _LANES), jnp.float32)
    for c in range(num_classes):
        xc = score_ref[0, c].astype(jnp.float32)
        sum_p = sum_p + jnp.exp(xc - m32)
        tgt = tgt + jnp.where(t == c, xc, 0.0)

    lse = jnp.log(sum_p) + m32
    # Overhang rows may hold garbage (NaN/Inf flows through exp/log), but
    # jnp.where is a select: the unselected branch never contaminates `loss`.
    loss = jnp.where(valid, lse - tgt, 0.0)

    loss_ref[...] = jnp.sum(loss, axis=0, keepdims=True).reshape(1, 1, 1, _LANES)
    cnt_ref[...] = (jnp.sum(valid.astype(jnp.int32), axis=0, keepdims=True)
                    .astype(jnp.float32).reshape(1, 1, 1, _LANES))


def _vmem_capacity_bytes():
    try:
        cap = int(pltpu.get_tpu_info().vmem_capacity_bytes)
        if cap > 0:
            return cap
    except Exception:
        pass
    return 64 << 20   # conservative fallback (v7x per-TensorCore VMEM)


def _choose_tile_s(S, N, C, itemsize, vmem_cap):
    """Pixel-row tile: as big as the VMEM budget allows (multiple of the sublane
    granularity), while keeping >= ~4 grid blocks for v7x's two TensorCores."""
    gran = 8 if itemsize >= 4 else (16 if itemsize == 2 else 32)
    if S <= gran:
        return S                                 # block == full dim, always legal
    per_buf_budget = min(vmem_cap // 4, _SCORE_BLOCK_BUDGET)   # input is double-buffered
    per_row_bytes = C * _LANES * itemsize
    tile_s = min(S, max(1, per_buf_budget // per_row_bytes))
    tile_s = max(gran, (tile_s // gran) * gran)
    # keep the grid big enough for both v7x TensorCores (>= ~4 blocks total)
    min_blocks = -(-4 // max(N, 1))
    if min_blocks > 1:
        cap = (S // min_blocks // gran) * gran
        tile_s = min(tile_s, cap) if cap >= gran else min(tile_s, gran)
    return tile_s


@jax.jit
def cross_entropy_loss(score, target):
    """score: [N, C, H, W] float (f32/bf16); target: [N, H, W] int labels.

    Returns the scalar mean cross-entropy over pixels with target != -1
    (NaN if every pixel is ignored), matching
    nn.CrossEntropyLoss(ignore_index=-1, reduction='mean')."""
    N, C, H, W = score.shape
    HW = H * W
    S = -(-HW // _LANES)
    HW_pad = S * _LANES

    # pure view reshapes (NCHW order preserved -> no HBM transpose pass)
    score_r = score.reshape(N, C, HW)
    target_r = target.reshape(N, HW).astype(jnp.int32)
    if HW_pad != HW:
        # NOTE: misaligned H*W pays an extra read+write of `score` through HBM
        # (~2x traffic) for this pad; padded pixels are masked via target = -1.
        score_r = jnp.pad(score_r, ((0, 0), (0, 0), (0, HW_pad - HW)))
        target_r = jnp.pad(target_r, ((0, 0), (0, HW_pad - HW)),
                           constant_values=IGNORE_LABEL)
    score_r = score_r.reshape(N, C, S, _LANES)
    target_r = target_r.reshape(N, S, _LANES)

    itemsize = jnp.dtype(score.dtype).itemsize
    vmem_cap = _vmem_capacity_bytes()
    tile_s = _choose_tile_s(S, N, C, itemsize, vmem_cap)
    num_j = -(-S // tile_s)

    # raise the scoped-VMEM limit so the sized-up blocks actually fit
    score_block = C * tile_s * _LANES * itemsize
    target_block = tile_s * _LANES * 4
    temps = 8 * tile_s * _LANES * 4             # kernel accumulators / masks
    needed = 2 * (score_block + target_block) + temps + (4 << 20)
    vmem_limit = int(min(int(vmem_cap * 0.9), max(needed, 32 << 20)))

    kernel = functools.partial(_ce_kernel, num_classes=C, tile_s=tile_s, s_total=S)
    loss_part, cnt_part = pl.pallas_call(
        kernel,
        out_shape=(
            jax.ShapeDtypeStruct((N, num_j, 1, _LANES), jnp.float32),
            jax.ShapeDtypeStruct((N, num_j, 1, _LANES), jnp.float32),
        ),
        grid=(N, num_j),
        in_specs=[
            pl.BlockSpec((1, C, tile_s, _LANES), lambda n, j: (n, 0, j, 0)),
            pl.BlockSpec((1, tile_s, _LANES), lambda n, j: (n, j, 0)),
        ],
        out_specs=(
            pl.BlockSpec((1, 1, 1, _LANES), lambda n, j: (n, j, 0, 0)),
            pl.BlockSpec((1, 1, 1, _LANES), lambda n, j: (n, j, 0, 0)),
        ),
        compiler_params=pltpu.CompilerParams(
            dimension_semantics=("parallel", "parallel"),
            vmem_limit_bytes=vmem_limit),
    )(score_r, target_r)

    # mean over non-ignored pixels (PyTorch 'mean' reduction with ignore_index)
    return (jnp.sum(loss_part) / jnp.sum(cnt_part)).astype(jnp.float32)


def _reference_loss(score, target):
    """Pure-JAX reference of nn.CrossEntropyLoss(ignore_index=-1)."""
    N, C, H, W = score.shape
    x = jnp.transpose(score, (0, 2, 3, 1)).reshape(-1, C).astype(jnp.float32)
    t = target.reshape(-1).astype(jnp.int32)
    valid = t != IGNORE_LABEL
    logp = jax.nn.log_softmax(x, axis=-1)
    t_safe = jnp.where(valid, t, 0)
    nll = -jnp.take_along_axis(logp, t_safe[:, None], axis=-1)[:, 0]
    nll = jnp.where(valid, nll, 0.0)
    return jnp.sum(nll) / jnp.sum(valid.astype(jnp.float32))


if __name__ == "__main__":
    key = jax.random.PRNGKey(0)
    k_score, k_tgt, k_ign, k_score2, k_tgt2 = jax.random.split(key, 5)

    # case 1: aligned H*W (multiple of 128), small shapes
    N, C, H, W = 2, 8, 16, 16
    score = jax.random.normal(k_score, (N, C, H, W), dtype=jnp.float32)
    target = jax.random.randint(k_tgt, (N, H, W), 0, C, dtype=jnp.int32)
    ignore_mask = jax.random.bernoulli(k_ign, 0.1, (N, H, W))
    target = jnp.where(ignore_mask, IGNORE_LABEL, target)

    loss = cross_entropy_loss(score, target)
    jax.block_until_ready(loss)
    ref = _reference_loss(score, target)
    assert jnp.allclose(loss, ref, rtol=1e-5, atol=1e-5), (loss, ref)

    # case 2: exercises the partial-last-block mask path (S % tile_s != 0)
    N2, C2, H2, W2 = 2, 8, 48, 48            # H*W = 2304 -> S = 18, tile_s = 8
    score2 = jax.random.normal(k_score2, (N2, C2, H2, W2), dtype=jnp.float32)
    target2 = jax.random.randint(k_tgt2, (N2, H2, W2), -1, C2, dtype=jnp.int32)
    loss2 = cross_entropy_loss(score2, target2)
    jax.block_until_ready(loss2)
    ref2 = _reference_loss(score2, target2)
    assert jnp.allclose(loss2, ref2, rtol=1e-5, atol=1e-5), (loss2, ref2)

    print("KERNEL_OK")
</pallas_src>

<mosaic_0001>
module attributes {stable_mosaic.version = 11 : i64} {
  func.func @_ce_kernel(%arg0: i32, %arg1: i32, %arg2: memref<1x8x2x128xf32, #tpu.memory_space<vmem>>, %arg3: memref<1x2x128xi32, #tpu.memory_space<vmem>>, %arg4: memref<1x1x1x128xf32, #tpu.memory_space<vmem>>, %arg5: memref<1x1x1x128xf32, #tpu.memory_space<vmem>>) attributes {dimension_semantics = [#tpu.dimension_semantics<parallel>, #tpu.dimension_semantics<parallel>], iteration_bounds = array<i64: 2, 1>, scalar_prefetch = 0 : i64, scratch_operands = 0 : i64, tpu.core_type = #tpu.core_type<tc>, window_params = [{transform_indices = @transform_0, window_bounds = array<i64: 1, 8, 2, 128>}, {transform_indices = @transform_1, window_bounds = array<i64: 1, 2, 128>}, {transform_indices = @transform_2, window_bounds = array<i64: 1, 1, 1, 128>}, {transform_indices = @transform_3, window_bounds = array<i64: 1, 1, 1, 128>}]} {
    %c0 = arith.constant 0 : index
    %c0_0 = arith.constant 0 : index
    %c0_1 = arith.constant 0 : index
    %0 = vector.load %arg3[%c0, %c0_0, %c0_1] : memref<1x2x128xi32, #tpu.memory_space<vmem>>, vector<1x2x128xi32>
    %1 = vector.shape_cast %0 : vector<1x2x128xi32> to vector<2x128xi32>
    %c-1_i32 = arith.constant -1 : i32
    %2 = vector.broadcast %c-1_i32 : i32 to vector<2x128xi32>
    %3 = arith.cmpi ne, %1, %2 : vector<2x128xi32>
    %c0_2 = arith.constant 0 : index
    %c0_3 = arith.constant 0 : index
    %c0_4 = arith.constant 0 : index
    %c0_5 = arith.constant 0 : index
    %4 = vector.load %arg2[%c0_2, %c0_3, %c0_4, %c0_5] : memref<1x8x2x128xf32, #tpu.memory_space<vmem>>, vector<1x1x2x128xf32>
    %5 = vector.shape_cast %4 : vector<1x1x2x128xf32> to vector<2x128xf32>
    %c0_6 = arith.constant 0 : index
    %c1 = arith.constant 1 : index
    %c0_7 = arith.constant 0 : index
    %c0_8 = arith.constant 0 : index
    %6 = vector.load %arg2[%c0_6, %c1, %c0_7, %c0_8] : memref<1x8x2x128xf32, #tpu.memory_space<vmem>>, vector<1x1x2x128xf32>
    %7 = vector.shape_cast %6 : vector<1x1x2x128xf32> to vector<2x128xf32>
    %8 = arith.maximumf %5, %7 : vector<2x128xf32>
    %c0_9 = arith.constant 0 : index
    %c2 = arith.constant 2 : index
    %c0_10 = arith.constant 0 : index
    %c0_11 = arith.constant 0 : index
    %9 = vector.load %arg2[%c0_9, %c2, %c0_10, %c0_11] : memref<1x8x2x128xf32, #tpu.memory_space<vmem>>, vector<1x1x2x128xf32>
    %10 = vector.shape_cast %9 : vector<1x1x2x128xf32> to vector<2x128xf32>
    %11 = arith.maximumf %8, %10 : vector<2x128xf32>
    %c0_12 = arith.constant 0 : index
    %c3 = arith.constant 3 : index
    %c0_13 = arith.constant 0 : index
    %c0_14 = arith.constant 0 : index
    %12 = vector.load %arg2[%c0_12, %c3, %c0_13, %c0_14] : memref<1x8x2x128xf32, #tpu.memory_space<vmem>>, vector<1x1x2x128xf32>
    %13 = vector.shape_cast %12 : vector<1x1x2x128xf32> to vector<2x128xf32>
    %14 = arith.maximumf %11, %13 : vector<2x128xf32>
    %c0_15 = arith.constant 0 : index
    %c4 = arith.constant 4 : index
    %c0_16 = arith.constant 0 : index
    %c0_17 = arith.constant 0 : index
    %15 = vector.load %arg2[%c0_15, %c4, %c0_16, %c0_17] : memref<1x8x2x128xf32, #tpu.memory_space<vmem>>, vector<1x1x2x128xf32>
    %16 = vector.shape_cast %15 : vector<1x1x2x128xf32> to vector<2x128xf32>
    %17 = arith.maximumf %14, %16 : vector<2x128xf32>
    %c0_18 = arith.constant 0 : index
    %c5 = arith.constant 5 : index
    %c0_19 = arith.constant 0 : index
    %c0_20 = arith.constant 0 : index
    %18 = vector.load %arg2[%c0_18, %c5, %c0_19, %c0_20] : memref<1x8x2x128xf32, #tpu.memory_space<vmem>>, vector<1x1x2x128xf32>
    %19 = vector.shape_cast %18 : vector<1x1x2x128xf32> to vector<2x128xf32>
    %20 = arith.maximumf %17, %19 : vector<2x128xf32>
    %c0_21 = arith.constant 0 : index
    %c6 = arith.constant 6 : index
    %c0_22 = arith.constant 0 : index
    %c0_23 = arith.constant 0 : index
    %21 = vector.load %arg2[%c0_21, %c6, %c0_22, %c0_23] : memref<1x8x2x128xf32, #tpu.memory_space<vmem>>, vector<1x1x2x128xf32>
    %22 = vector.shape_cast %21 : vector<1x1x2x128xf32> to vector<2x128xf32>
    %23 = arith.maximumf %20, %22 : vector<2x128xf32>
    %c0_24 = arith.constant 0 : index
    %c7 = arith.constant 7 : index
    %c0_25 = arith.constant 0 : index
    %c0_26 = arith.constant 0 : index
    %24 = vector.load %arg2[%c0_24, %c7, %c0_25, %c0_26] : memref<1x8x2x128xf32, #tpu.memory_space<vmem>>, vector<1x1x2x128xf32>
    %25 = vector.shape_cast %24 : vector<1x1x2x128xf32> to vector<2x128xf32>
    %26 = arith.maximumf %23, %25 : vector<2x128xf32>
    %cst = arith.constant 0.000000e+00 : f32
    %27 = vector.broadcast %cst : f32 to vector<2x128xf32>
    %cst_27 = arith.constant 0.000000e+00 : f32
    %28 = vector.broadcast %cst_27 : f32 to vector<2x128xf32>
    %c0_28 = arith.constant 0 : index
    %c0_29 = arith.constant 0 : index
    %c0_30 = arith.constant 0 : index
    %c0_31 = arith.constant 0 : index
    %29 = vector.load %arg2[%c0_28, %c0_29, %c0_30, %c0_31] : memref<1x8x2x128xf32, #tpu.memory_space<vmem>>, vector<1x1x2x128xf32>
    %30 = vector.shape_cast %29 : vector<1x1x2x128xf32> to vector<2x128xf32>
    %31 = arith.subf %30, %26 : vector<2x128xf32>
    %32 = math.exp %31 : vector<2x128xf32>
    %33 = arith.addf %27, %32 : vector<2x128xf32>
    %c0_i32 = arith.constant 0 : i32
    %34 = vector.broadcast %c0_i32 : i32 to vector<2x128xi32>
    %35 = arith.cmpi eq, %1, %34 : vector<2x128xi32>
    %cst_32 = arith.constant 0.000000e+00 : f32
    %36 = vector.broadcast %cst_32 : f32 to vector<2x128xf32>
    %37 = arith.select %35, %30, %36 : vector<2x128xi1>, vector<2x128xf32>
    %38 = arith.addf %28, %37 : vector<2x128xf32>
    %c0_33 = arith.constant 0 : index
    %c1_34 = arith.constant 1 : index
    %c0_35 = arith.constant 0 : index
    %c0_36 = arith.constant 0 : index
    %39 = vector.load %arg2[%c0_33, %c1_34, %c0_35, %c0_36] : memref<1x8x2x128xf32, #tpu.memory_space<vmem>>, vector<1x1x2x128xf32>
    %40 = vector.shape_cast %39 : vector<1x1x2x128xf32> to vector<2x128xf32>
    %41 = arith.subf %40, %26 : vector<2x128xf32>
    %42 = math.exp %41 : vector<2x128xf32>
    %43 = arith.addf %33, %42 : vector<2x128xf32>
    %c1_i32 = arith.constant 1 : i32
    %44 = vector.broadcast %c1_i32 : i32 to vector<2x128xi32>
    %45 = arith.cmpi eq, %1, %44 : vector<2x128xi32>
    %cst_37 = arith.constant 0.000000e+00 : f32
    %46 = vector.broadcast %cst_37 : f32 to vector<2x128xf32>
    %47 = arith.select %45, %40, %46 : vector<2x128xi1>, vector<2x128xf32>
    %48 = arith.addf %38, %47 : vector<2x128xf32>
    %c0_38 = arith.constant 0 : index
    %c2_39 = arith.constant 2 : index
    %c0_40 = arith.constant 0 : index
    %c0_41 = arith.constant 0 : index
    %49 = vector.load %arg2[%c0_38, %c2_39, %c0_40, %c0_41] : memref<1x8x2x128xf32, #tpu.memory_space<vmem>>, vector<1x1x2x128xf32>
    %50 = vector.shape_cast %49 : vector<1x1x2x128xf32> to vector<2x128xf32>
    %51 = arith.subf %50, %26 : vector<2x128xf32>
    %52 = math.exp %51 : vector<2x128xf32>
    %53 = arith.addf %43, %52 : vector<2x128xf32>
    %c2_i32 = arith.constant 2 : i32
    %54 = vector.broadcast %c2_i32 : i32 to vector<2x128xi32>
    %55 = arith.cmpi eq, %1, %54 : vector<2x128xi32>
    %cst_42 = arith.constant 0.000000e+00 : f32
    %56 = vector.broadcast %cst_42 : f32 to vector<2x128xf32>
    %57 = arith.select %55, %50, %56 : vector<2x128xi1>, vector<2x128xf32>
    %58 = arith.addf %48, %57 : vector<2x128xf32>
    %c0_43 = arith.constant 0 : index
    %c3_44 = arith.constant 3 : index
    %c0_45 = arith.constant 0 : index
    %c0_46 = arith.constant 0 : index
    %59 = vector.load %arg2[%c0_43, %c3_44, %c0_45, %c0_46] : memref<1x8x2x128xf32, #tpu.memory_space<vmem>>, vector<1x1x2x128xf32>
    %60 = vector.shape_cast %59 : vector<1x1x2x128xf32> to vector<2x128xf32>
    %61 = arith.subf %60, %26 : vector<2x128xf32>
    %62 = math.exp %61 : vector<2x128xf32>
    %63 = arith.addf %53, %62 : vector<2x128xf32>
    %c3_i32 = arith.constant 3 : i32
    %64 = vector.broadcast %c3_i32 : i32 to vector<2x128xi32>
    %65 = arith.cmpi eq, %1, %64 : vector<2x128xi32>
    %cst_47 = arith.constant 0.000000e+00 : f32
    %66 = vector.broadcast %cst_47 : f32 to vector<2x128xf32>
    %67 = arith.select %65, %60, %66 : vector<2x128xi1>, vector<2x128xf32>
    %68 = arith.addf %58, %67 : vector<2x128xf32>
    %c0_48 = arith.constant 0 : index
    %c4_49 = arith.constant 4 : index
    %c0_50 = arith.constant 0 : index
    %c0_51 = arith.constant 0 : index
    %69 = vector.load %arg2[%c0_48, %c4_49, %c0_50, %c0_51] : memref<1x8x2x128xf32, #tpu.memory_space<vmem>>, vector<1x1x2x128xf32>
    %70 = vector.shape_cast %69 : vector<1x1x2x128xf32> to vector<2x128xf32>
    %71 = arith.subf %70, %26 : vector<2x128xf32>
    %72 = math.exp %71 : vector<2x128xf32>
    %73 = arith.addf %63, %72 : vector<2x128xf32>
    %c4_i32 = arith.constant 4 : i32
    %74 = vector.broadcast %c4_i32 : i32 to vector<2x128xi32>
    %75 = arith.cmpi eq, %1, %74 : vector<2x128xi32>
    %cst_52 = arith.constant 0.000000e+00 : f32
    %76 = vector.broadcast %cst_52 : f32 to vector<2x128xf32>
    %77 = arith.select %75, %70, %76 : vector<2x128xi1>, vector<2x128xf32>
    %78 = arith.addf %68, %77 : vector<2x128xf32>
    %c0_53 = arith.constant 0 : index
    %c5_54 = arith.constant 5 : index
    %c0_55 = arith.constant 0 : index
    %c0_56 = arith.constant 0 : index
    %79 = vector.load %arg2[%c0_53, %c5_54, %c0_55, %c0_56] : memref<1x8x2x128xf32, #tpu.memory_space<vmem>>, vector<1x1x2x128xf32>
    %80 = vector.shape_cast %79 : vector<1x1x2x128xf32> to vector<2x128xf32>
    %81 = arith.subf %80, %26 : vector<2x128xf32>
    %82 = math.exp %81 : vector<2x128xf32>
    %83 = arith.addf %73, %82 : vector<2x128xf32>
    %c5_i32 = arith.constant 5 : i32
    %84 = vector.broadcast %c5_i32 : i32 to vector<2x128xi32>
    %85 = arith.cmpi eq, %1, %84 : vector<2x128xi32>
    %cst_57 = arith.constant 0.000000e+00 : f32
    %86 = vector.broadcast %cst_57 : f32 to vector<2x128xf32>
    %87 = arith.select %85, %80, %86 : vector<2x128xi1>, vector<2x128xf32>
    %88 = arith.addf %78, %87 : vector<2x128xf32>
    %c0_58 = arith.constant 0 : index
    %c6_59 = arith.constant 6 : index
    %c0_60 = arith.constant 0 : index
    %c0_61 = arith.constant 0 : index
    %89 = vector.load %arg2[%c0_58, %c6_59, %c0_60, %c0_61] : memref<1x8x2x128xf32, #tpu.memory_space<vmem>>, vector<1x1x2x128xf32>
    %90 = vector.shape_cast %89 : vector<1x1x2x128xf32> to vector<2x128xf32>
    %91 = arith.subf %90, %26 : vector<2x128xf32>
    %92 = math.exp %91 : vector<2x128xf32>
    %93 = arith.addf %83, %92 : vector<2x128xf32>
    %c6_i32 = arith.constant 6 : i32
    %94 = vector.broadcast %c6_i32 : i32 to vector<2x128xi32>
    %95 = arith.cmpi eq, %1, %94 : vector<2x128xi32>
    %cst_62 = arith.constant 0.000000e+00 : f32
    %96 = vector.broadcast %cst_62 : f32 to vector<2x128xf32>
    %97 = arith.select %95, %90, %96 : vector<2x128xi1>, vector<2x128xf32>
    %98 = arith.addf %88, %97 : vector<2x128xf32>
    %c0_63 = arith.constant 0 : index
    %c7_64 = arith.constant 7 : index
    %c0_65 = arith.constant 0 : index
    %c0_66 = arith.constant 0 : index
    %99 = vector.load %arg2[%c0_63, %c7_64, %c0_65, %c0_66] : memref<1x8x2x128xf32, #tpu.memory_space<vmem>>, vector<1x1x2x128xf32>
    %100 = vector.shape_cast %99 : vector<1x1x2x128xf32> to vector<2x128xf32>
    %101 = arith.subf %100, %26 : vector<2x128xf32>
    %102 = math.exp %101 : vector<2x128xf32>
    %103 = arith.addf %93, %102 : vector<2x128xf32>
    %c7_i32 = arith.constant 7 : i32
    %104 = vector.broadcast %c7_i32 : i32 to vector<2x128xi32>
    %105 = arith.cmpi eq, %1, %104 : vector<2x128xi32>
    %cst_67 = arith.constant 0.000000e+00 : f32
    %106 = vector.broadcast %cst_67 : f32 to vector<2x128xf32>
    %107 = arith.select %105, %100, %106 : vector<2x128xi1>, vector<2x128xf32>
    %108 = arith.addf %98, %107 : vector<2x128xf32>
    %109 = math.log %103 : vector<2x128xf32>
    %110 = arith.addf %109, %26 : vector<2x128xf32>
    %111 = arith.subf %110, %108 : vector<2x128xf32>
    %cst_68 = arith.constant 0.000000e+00 : f32
    %112 = vector.broadcast %cst_68 : f32 to vector<2x128xf32>
    %113 = arith.select %3, %111, %112 : vector<2x128xi1>, vector<2x128xf32>
    %cst_69 = arith.constant dense<0.000000e+00> : vector<128xf32>
    %114 = vector.multi_reduction <add>, %113, %cst_69 [0] : vector<2x128xf32> to vector<128xf32>
    %115 = vector.shape_cast %114 : vector<128xf32> to vector<1x128xf32>
    %116 = vector.shape_cast %115 : vector<1x128xf32> to vector<1x1x1x128xf32>
    %c0_70 = arith.constant 0 : index
    %c0_71 = arith.constant 0 : index
    %c0_72 = arith.constant 0 : index
    %c0_73 = arith.constant 0 : index
    %117 = vector.load %arg4[%c0_70, %c0_71, %c0_72, %c0_73] : memref<1x1x1x128xf32, #tpu.memory_space<vmem>>, vector<1x1x1x128xf32>
    tpu.vector_store %arg4[%c0_70, %c0_71, %c0_72, %c0_73], %116 {strides = array<i32>} : memref<1x1x1x128xf32, #tpu.memory_space<vmem>>, vector<1x1x1x128xf32>,
    %118 = arith.extui %3 : vector<2x128xi1> to vector<2x128xi32>
    %cst_74 = arith.constant dense<0> : vector<128xi32>
    %119 = vector.multi_reduction <add>, %118, %cst_74 [0] : vector<2x128xi32> to vector<128xi32>
    %120 = vector.shape_cast %119 : vector<128xi32> to vector<1x128xi32>
    %121 = arith.sitofp %120 : vector<1x128xi32> to vector<1x128xf32>
    %122 = vector.shape_cast %121 : vector<1x128xf32> to vector<1x1x1x128xf32>
    %c0_75 = arith.constant 0 : index
    %c0_76 = arith.constant 0 : index
    %c0_77 = arith.constant 0 : index
    %c0_78 = arith.constant 0 : index
    %123 = vector.load %arg5[%c0_75, %c0_76, %c0_77, %c0_78] : memref<1x1x1x128xf32, #tpu.memory_space<vmem>>, vector<1x1x1x128xf32>
    tpu.vector_store %arg5[%c0_75, %c0_76, %c0_77, %c0_78], %122 {strides = array<i32>} : memref<1x1x1x128xf32, #tpu.memory_space<vmem>>, vector<1x1x1x128xf32>,
    return
  }
  func.func @transform_0(%arg0: i32, %arg1: i32) -> (i32, i32, i32, i32) {
    %c0_i32 = arith.constant 0 : i32
    %c0_i32_0 = arith.constant 0 : i32
    %c0_i32_1 = arith.constant 0 : i32
    return %arg0, %c0_i32, %arg1, %c0_i32_0 : i32, i32, i32, i32
  }
  func.func @transform_1(%arg0: i32, %arg1: i32) -> (i32, i32, i32) {
    %c0_i32 = arith.constant 0 : i32
    %c0_i32_0 = arith.constant 0 : i32
    return %arg0, %arg1, %c0_i32 : i32, i32, i32
  }
  func.func @transform_2(%arg0: i32, %arg1: i32) -> (i32, i32, i32, i32) {
    %c0_i32 = arith.constant 0 : i32
    %c0_i32_0 = arith.constant 0 : i32
    %c0_i32_1 = arith.constant 0 : i32
    return %arg0, %arg1, %c0_i32, %c0_i32_0 : i32, i32, i32, i32
  }
  func.func @transform_3(%arg0: i32, %arg1: i32) -> (i32, i32, i32, i32) {
    %c0_i32 = arith.constant 0 : i32
    %c0_i32_0 = arith.constant 0 : i32
    %c0_i32_1 = arith.constant 0 : i32
    return %arg0, %arg1, %c0_i32, %c0_i32_0 : i32, i32, i32, i32
  }
}

</mosaic_0001>

<bundles_post_ra>
// kernel: cross_entropy_loss.1
= control target key start
LH: loop header
LB: loop body
LE: loop exit
PB: predicated region body
PF: predicated region fallthrough
CT: control target
= control target key end

     0   :  { %s574_s12 = smov 0   ;;  %s576_s13 = smov 0   ;;  %s677_s0 = inlined_call_operand.vmem [shape: f32[2,8,2,128], index: 0, kind: input, shape index: {}]   ;;  %s678_s1 = inlined_call_operand.vmem [shape: s32[2,2,128], index: 1, kind: input, shape index: {}]   ;;  %s679_s2 = inlined_call_operand.vmem [shape: f32[2,1,1,128], index: 2, kind: output, shape index: {0}]   ;;  %s680_s3 = inlined_call_operand.vmem [shape: f32[2,1,1,128], index: 3, kind: output, shape index: {1}]  }
   0x1   :  { %s578_s14 = smov 0  }
   0x2 LB: > { %s26_s15 = sadd.s32 1, %s547_s13  ;;  %p472_p0 = scmp.ge.s32.totalorder %s551_s14, 1  ;;  %s551_s14 = sphi %s578_s14, %s14_s14   ;;  %s547_s13 = sphi %s576_s13, %s682_s13   ;;  %s543_s12 = sphi %s574_s12, %s681_s12  }
   0x3   : > { %p28_p1 = scmp.ge.s32.totalorder %s26_s15, 2  ;;  %p175_p2 = scmp.lt.s32.totalorder %s551_s14, 3 }
   0x5   : > { %s684_s15 = smov (%p28_p1, %s26_s15), 0  ;;  %p176_p3 = pnand %p472_p0, %p175_p2 }
   0x6   : > { %p216_p4 = scmp.lt.s32.totalorder (!%p176_p3), %s543_s12, 1 }
   0x7   : > { %179 = sbr.rel (%p176_p3) target bundleno = 98 (0x62), region = 28 }
   0xc   : > { %s686_s12 = smov (!%p216_p4, %s543_s12), 1  ;;  %vm328_vm1 = vcmask 1041408   ;;  %v553_v10 = vmov 0  }
   0xd   : > { %s485_s16 = sshll.u32 %s686_s12, 4  ;;  %s475_s17 = sshll.u32 %s686_s12, 1 }
   0xe   : > { %s223_s20 = scalar_lea.vmem %s677_s0, %s485_s16  ;;  %s230_s23 = scalar_lea.vmem %s678_s1, %s475_s17 }
   0xf   : > { %v245_v0 = vld [vmem:[%s223_s20] sm:$0x3]  ;;  %v476_v1 = vld [vmem:[%s223_s20 + $0x2] sm:$0x3]  ;;  %v602_v3 = vld [vmem:[%s223_s20 + $0x4] sm:$0x3]  ;;  %s242_s26 = scalar_lea.vmem %s680_s3, %s686_s12  ;;  %s236_s29 = scalar_lea.vmem %s679_s2, %s686_s12 }
  0x10   : > { %v248_v2 = vmax.f32 %v245_v0, %v476_v1  ;;  %v604_v4 = vld [vmem:[%s230_s23] sm:$0x3]  ;;  %v606_v5 = vld [vmem:[%s223_s20 + $0x6] sm:$0x3]  ;;  %v610_v7 = vld [vmem:[%s223_s20 + $0x8] sm:$0x3] }
  0x11   : > { %vm244_vm0 = vcmp.ne.s32.totalorder %v604_v4, 4294967295  ;;  %v613_v9 = vld [vmem:[%s223_s20 + $0xa] sm:$0x3]  ;;  %v618_v13 = vld [vmem:[%s223_s20 + $0xc] sm:$0x3]  ;;  %vm271_vm2 = vcmp.eq.s32.totalorder %v604_v4, 0 }
  0x12   : > { %v251_v6 = vmax.f32 %v248_v2, %v602_v3  ;;  %v337_v11 = vsel %vm244_vm0, 1, %v553_v10  ;;  %v622_v17 = vld [vmem:[%s223_s20 + $0xe] sm:$0x3]  ;;  %vm278_vm3 = vcmp.eq.s32.totalorder %v604_v4, 1  ;;  %v272_v47 = vsel %vm271_vm2, %v245_v0, 0.0 }
  0x13   : > { %v338_v14 = vsel %vm328_vm1, %v337_v11, 0  ;;  %v279_v48 = vsel %vm278_vm3, %v476_v1, 0.0  ;;  %vm285_vm4 = vcmp.eq.s32.totalorder %v604_v4, 2  ;;  %vm292_vm5 = vcmp.eq.s32.totalorder %v604_v4, 3 }
  0x14   : > { %v254_v8 = vmax.f32 %v251_v6, %v606_v5  ;;  %v339_v16 = vrot.slane %v338_v14, 4  ;;  %v280_v51 = vadd.f32 %v279_v48, %v272_v47  ;;  %v286_v54 = vsel %vm285_vm4, %v602_v3, 0.0 }
  0x15   : > { %v293_v60 = vsel %vm292_vm5, %v606_v5, 0.0  ;;  %vm299_vm6 = vcmp.eq.s32.totalorder %v604_v4, 4  ;;  %vm306_vm7 = vcmp.eq.s32.totalorder %v604_v4, 5  ;;  %vm313_vm8 = vcmp.eq.s32.totalorder %v604_v4, 6 }
  0x16   : > { %v257_v12 = vmax.f32 %v254_v8, %v610_v7  ;;  %v340_v19 = vadd.s32 %v339_v16, %v338_v14  ;;  %v287_v57 = vadd.f32 %v286_v54, %v280_v51  ;;  %v307_v2 = vsel %vm306_vm7, %v613_v9, 0.0 }
  0x17   : > { %v314_v6 = vsel %vm313_vm8, %v618_v13, 0.0  ;;  %vm320_vm9 = vcmp.eq.s32.totalorder %v604_v4, 7 }
  0x18   : > { %v260_v15 = vmax.f32 %v257_v12, %v613_v9  ;;  %v341_v21 = vrot.slane %v340_v19, 2  ;;  %v294_v62 = vadd.f32 %v293_v60, %v287_v57  ;;  %v321_v8 = vsel %vm320_vm9, %v622_v17, 0.0 }
  0x1a   : > { %v263_v18 = vmax.f32 %v260_v15, %v618_v13  ;;  %v342_v32 = vadd.s32 %v341_v21, %v340_v19 }
  0x1c   : > { %v626_v20 = vmax.f32 %v263_v18, %v622_v17  ;;  %v343_v35 = vrot.slane %v342_v32, 1 }
  0x1e   : > { %v267_v22 = vsub.f32 %v245_v0, %v626_v20  ;;  %v274_v23 = vsub.f32 %v476_v1, %v626_v20  ;;  %v281_v24 = vsub.f32 %v602_v3, %v626_v20  ;;  %v288_v25 = vsub.f32 %v606_v5, %v626_v20 }
  0x1f   : > { %v295_v26 = vsub.f32 %v610_v7, %v626_v20  ;;  %v302_v31 = vsub.f32 %v613_v9, %v626_v20  ;;  %v309_v34 = vsub.f32 %v618_v13, %v626_v20  ;;  %v316_v37 = vsub.f32 %v622_v17, %v626_v20 }
  0x20   : > { %v268_v27 = vmul.f32 1.442695, %v267_v22  ;;  %v275_v28 = vmul.f32 1.442695, %v274_v23  ;;  %v282_v29 = vmul.f32 1.442695, %v281_v24  ;;  %v344_v38 = vadd.s32 %v343_v35, %v342_v32 }
  0x21   : > { %v289_v30 = vmul.f32 1.442695, %v288_v25  ;;  %v296_v33 = vmul.f32 1.442695, %v295_v26  ;;  %v303_v36 = vmul.f32 1.442695, %v302_v31 }
  0x22   : > { %511 = vpow2.f32 %v268_v27  ;;  %v310_v39 = vmul.f32 1.442695, %v309_v34  ;;  %v345_v40 = vcvt.s32.f32 %v344_v38  ;;  %v317_v41 = vmul.f32 1.442695, %v316_v37 }
  0x23   : > { %513 = vpow2.f32 %v275_v28  ;;  %v300_v0 = vsel %vm299_vm6, %v610_v7, 0.0 }
  0x24   : > { %515 = vpow2.f32 %v282_v29  ;;  %346 = vst [vmem:[%s242_s26] sm:$0x1] %v345_v40  ;;  %v301_v1 = vadd.f32 %v300_v0, %v294_v62 }
  0x25   : > { %517 = vpow2.f32 %v289_v30 }
  0x26   : > { %519 = vpow2.f32 %v296_v33  ;;  %v308_v3 = vadd.f32 %v307_v2, %v301_v1 }
  0x27   : > { %521 = vpow2.f32 %v303_v36 }
  0x28   : > { %523 = vpow2.f32 %v310_v39  ;;  %v315_v5 = vadd.f32 %v314_v6, %v308_v3 }
  0x29   : > { %525 = vpow2.f32 %v317_v41 }
  0x2a   : > { %v322_v11 = vadd.f32 %v321_v8, %v315_v5 }
  0x2f   : > { %v512_v42 = vpop.eup %511 }
  0x30   : > { %v514_v43 = vpop.eup %513 }
  0x31   : > { %v516_v44 = vpop.eup %515  ;;  %v277_v45 = vadd.f32 %v514_v43, %v512_v42 }
  0x32   : > { %v518_v46 = vpop.eup %517 }
  0x33   : > { %v284_v49 = vadd.f32 %v516_v44, %v277_v45  ;;  %v520_v50 = vpop.eup %519 }
  0x34   : > { %v522_v53 = vpop.eup %521 }
  0x35   : > { %v291_v52 = vadd.f32 %v518_v46, %v284_v49  ;;  %v524_v56 = vpop.eup %523 }
  0x36   : > { %v526_v59 = vpop.eup %525 }
  0x37   : > { %v298_v55 = vadd.f32 %v520_v50, %v291_v52 }
  0x39   : > { %v305_v58 = vadd.f32 %v522_v53, %v298_v55 }
  0x3b   : > { %v312_v61 = vadd.f32 %v524_v56, %v305_v58 }
  0x3d   : > { %v319_v63 = vadd.f32 %v526_v59, %v312_v61 }
  0x3f   : > { %527 = vlog2.f32 %v319_v63 }
  0x4c   : > { %v528_v10 = vpop.eup %527 }
  0x4d   : > { %v324_v7 = vmul.f32 0.6931472, %v528_v10 }
  0x4f   : > { %v325_v12 = vadd.f32 %v324_v7, %v626_v20 }
  0x51   : > { %v326_v14 = vsub.f32 %v325_v12, %v322_v11 }
  0x53   : > { %v327_v9 = vsel %vm244_vm0, %v326_v14, 0.0 }
  0x54   : > { %v329_v15 = vsel %vm328_vm1, %v327_v9, 0.0 }
  0x55   : > { %v330_v16 = vrot.slane %v329_v15, 4 }
  0x57   : > { %v331_v18 = vadd.f32 %v330_v16, %v329_v15 }
  0x59   : > { %v332_v13 = vrot.slane %v331_v18, 2 }
  0x5b   : > { %v333_v19 = vadd.f32 %v332_v13, %v331_v18 }
  0x5d   : > { %v334_v21 = vrot.slane %v333_v19, 1 }
  0x5f   : > { %v335_v17 = vadd.f32 %v334_v21, %v333_v19 }
  0x61   : > { %336 = vst [vmem:[%s236_s29] sm:$0x1] %v335_v17 }
  0x62 PF: > { %s14_s14 = sadd.s32 1, %s551_s14   ;;  %s681_s12 = smov %s547_s13 }
  0x63   : > { %p11_p5 = scmp.ge.s32.totalorder %s14_s14, 4   ;;  %s682_s13 = smov %s684_s15 }
  0x65   :  { %13 = sbr.rel (!%p11_p5) target bundleno = 2 (0x2), region = 80 }

</bundles_post_ra>
